<compile_context>
chip_gen: v7x
topology: tpu7x:2x2x1
jax: 0.10.0
libtpu: 0.0.40
codegen_flags: <defaults>
</compile_context>

<pallas_src>
import math

import numpy as np
import jax
import jax.numpy as jnp
from jax.experimental import pallas as pl
from jax.experimental.pallas import tpu as pltpu

# ---------------------------------------------------------------------------
# PU21 banding-glare coefficients (Mantiuk, Denes, Zerman 2021)
# ---------------------------------------------------------------------------
_PU21_P = (0.353487901, 0.3734658629, 8.277049286e-05,
           0.9062562627, 0.09150303166, 0.9099517204, 596.3148142)
_PU_L_MIN = 0.005
_PU_L_MAX = 10000.0
_GAMMA = 2.2

_LANES = 128            # lane-dense last dim (one full vreg width)
_SUBLANES = 8           # f32 sublane granularity
_BLOCK_ROWS_MAX = 2048  # (2048, 128) f32 = 1 MiB per buffer


def _pu21_scalar(Y):
    """Host-side PU21 encode of a python float (for normalization constants)."""
    p0, p1, p2, p3, p4, p5, p6 = _PU21_P
    Y = min(max(float(Y), _PU_L_MIN), _PU_L_MAX)
    Yp = Y ** p3
    return p6 * (((p0 + p1 * Yp) / (1.0 + p2 * Yp)) ** p4 - p5)


# ---------------------------------------------------------------------------
# Pallas kernel: display model -> PU21 -> affine normalization (fused)
# ---------------------------------------------------------------------------
def _pu_display_kernel(params_ref, x_ref, o_ref):
    # params_ref lives in SMEM (scalar prefetch):
    #   [gain, offset, scale, shift]
    #   gain   = L_max - L_blk
    #   offset = L_blk + reflectivity * E_amb / pi
    #   scale  = s * p6              (s, o = fused PU-range + mean/std norm)
    #   shift  = o - s * p6 * p5
    gain = params_ref[0]
    offset = params_ref[1]
    scale = params_ref[2]
    shift = params_ref[3]

    p0, p1, p2, p3, p4, _p5, _p6 = _PU21_P

    x = x_ref[...].astype(jnp.float32)

    # Display model (simple sRGB, gamma 2.2): display-encoded [0,1] -> cd/m2.
    L = gain * jnp.power(jnp.maximum(x, 0.0), _GAMMA) + offset
    L = jnp.clip(L, _PU_L_MIN, _PU_L_MAX)

    # PU21 (banding-glare) encoding; p6/p5 and all normalization folded into
    # (scale, shift) host-side.  Power / exp / log run on the EUP slot.
    Lp = jnp.power(L, p3)
    r = (p0 + p1 * Lp) / (1.0 + p2 * Lp)
    o_ref[...] = (scale * jnp.power(r, p4) + shift).astype(o_ref.dtype)


# ---------------------------------------------------------------------------
# Wrapper (scalar setup, lane-dense view, pallas_call)
# ---------------------------------------------------------------------------
def pu_display_forward(x_nchw,
                       *,
                       L_max,
                       L_min=1.0,
                       L_cr=1.0,
                       reflectivity=0.01,
                       E_amb=0.0,
                       normalize_pu=True,
                       normalize_range_srgb=True,
                       normalize_mean_std=True,
                       out_dtype=jnp.float32):
    orig_shape = x_nchw.shape
    total = int(np.prod(orig_shape))

    # ----- lane-dense (rows, 128) view, rows padded to a multiple of 8 ------
    chunk = _SUBLANES * _LANES                      # 1024 elements
    padded_total = ((total + chunk - 1) // chunk) * chunk
    flat = x_nchw.reshape(-1)                       # free (contiguous reshape)
    if padded_total != total:
        # TODO(synk): only taken when total % 1024 != 0 (tiny remainder pad).
        flat = jnp.pad(flat, (0, padded_total - total))
    rows = padded_total // _LANES                   # multiple of 8
    x2d = flat.reshape(rows, _LANES)

    # Block: up to (2048, 128) f32 = 1 MiB; any partial edge block (still a
    # multiple of 8 rows) is handled by Pallas masking.
    block_rows = min(_BLOCK_ROWS_MAX, rows)
    n_blk = pl.cdiv(rows, block_rows)

    # ----- host-side scalar parameters (python floats in the reference) -----
    L_blk = (L_max / L_cr) if L_cr > 1.0 else L_min
    L_refl = reflectivity * E_amb / math.pi
    gain = L_max - L_blk
    offset = L_blk + L_refl

    p5, p6 = _PU21_P[5], _PU21_P[6]
    if normalize_pu:
        P_min = _pu21_scalar(_PU_L_MIN)
        P_max = _pu21_scalar(100.0 if normalize_range_srgb else _PU_L_MAX)
        s = 1.0 / (P_max - P_min)
        o = -P_min * s
    else:
        s, o = 1.0, 0.0
    if normalize_mean_std:
        # torchvision functional.normalize with mean = std = (0.5, 0.5, 0.5):
        # channel-independent, so it folds into the same scalar affine.
        s, o = s / 0.5, (o - 0.5) / 0.5
    # Fold PU21 p6 / p5 into the affine normalization.
    scale = s * p6
    shift = o - s * p6 * p5

    params = jnp.array([gain, offset, scale, shift], dtype=jnp.float32)

    in_itemsize = jnp.dtype(x_nchw.dtype).itemsize
    out_itemsize = jnp.dtype(out_dtype).itemsize

    out2d = pl.pallas_call(
        _pu_display_kernel,
        out_shape=jax.ShapeDtypeStruct((rows, _LANES), out_dtype),
        grid_spec=pltpu.PrefetchScalarGridSpec(
            num_scalar_prefetch=1,
            grid=(n_blk,),
            in_specs=[
                pl.BlockSpec((block_rows, _LANES), lambda i, p_ref: (i, 0)),
            ],
            out_specs=pl.BlockSpec((block_rows, _LANES),
                                   lambda i, p_ref: (i, 0)),
        ),
        compiler_params=pltpu.CompilerParams(
            dimension_semantics=("parallel",)),
        cost_estimate=pl.CostEstimate(
            flops=12 * total,
            transcendentals=6 * total,
            bytes_accessed=(in_itemsize + out_itemsize) * total),
    )(params, x2d)

    out_flat = out2d.reshape(-1)
    if padded_total != total:
        out_flat = out_flat[:total]
    return out_flat.reshape(orig_shape)


# ---------------------------------------------------------------------------
# Plain-JAX reference (unfused formula; for the sanity check only)
# ---------------------------------------------------------------------------
def _reference(x, gain, offset, s, o):
    p0, p1, p2, p3, p4, p5, p6 = _PU21_P
    L = gain * jnp.power(jnp.maximum(x, 0.0), _GAMMA) + offset
    L = jnp.clip(L, _PU_L_MIN, _PU_L_MAX)
    Lp = jnp.power(L, p3)
    V = p6 * (jnp.power((p0 + p1 * Lp) / (1.0 + p2 * Lp), p4) - p5)
    return V * s + o


if __name__ == "__main__":
    # Deterministic example input: NCHW, display-encoded sRGB values in [0, 1].
    key = jax.random.PRNGKey(0)
    x = jax.random.uniform(key, (2, 3, 16, 16), dtype=jnp.float32)
    # Include edge values: exact zero, slightly negative (clamped), exact one.
    x = x.at[0, 0, 0, 0].set(0.0)
    x = x.at[0, 0, 0, 1].set(-0.1)
    x = x.at[0, 0, 0, 2].set(1.0)

    # Host-side randomization exactly as in PuDisplayWrapperRandomized.forward.
    np.random.seed(0)
    rand_ambient_mean, rand_ambient_delta = 100.0, 25.0
    display_L_max, rand_L_max_delta = 1000.0, 15.0
    E_amb = rand_ambient_mean + rand_ambient_delta * float(np.random.randn(1)[0])
    E_amb = max(0.0, E_amb)
    L_max = display_L_max + rand_L_max_delta * float(np.random.randn(1)[0])

    out = pu_display_forward(x,
                             L_max=L_max,
                             L_min=1.0,
                             L_cr=1.0,
                             reflectivity=0.01,
                             E_amb=E_amb)
    out = jax.block_until_ready(out)

    # Sanity check against plain JAX (unfused normalization path).
    L_blk = 1.0
    gain = L_max - L_blk
    offset = L_blk + 0.01 * E_amb / math.pi
    P_min, P_max = _pu21_scalar(_PU_L_MIN), _pu21_scalar(100.0)
    s = (1.0 / (P_max - P_min)) / 0.5
    o = ((-P_min / (P_max - P_min)) - 0.5) / 0.5
    ref = _reference(x, gain, offset, s, o)
    np.testing.assert_allclose(np.asarray(out), np.asarray(ref),
                               rtol=2e-4, atol=2e-4)
    assert out.shape == x.shape and out.dtype == jnp.float32

    print("KERNEL_OK")
</pallas_src>

<mosaic_0001>
module attributes {stable_mosaic.version = 11 : i64} {
  func.func @_pu_display_kernel(%arg0: i32, %arg1: memref<4xf32, #tpu.memory_space<smem>>, %arg2: memref<16x128xf32, #tpu.memory_space<vmem>>, %arg3: memref<16x128xf32, #tpu.memory_space<vmem>>) attributes {dimension_semantics = [#tpu.dimension_semantics<parallel>], iteration_bounds = array<i64: 1>, scalar_prefetch = 1 : i64, scratch_operands = 0 : i64, tpu.core_type = #tpu.core_type<tc>, window_params = [{transform_indices = @transform_0, window_bounds = array<i64: 16, 128>}, {transform_indices = @transform_1, window_bounds = array<i64: 16, 128>}]} {
    %c0 = arith.constant 0 : index
    %0 = memref.load %arg1[%c0] : memref<4xf32, #tpu.memory_space<smem>>
    %c1 = arith.constant 1 : index
    %1 = memref.load %arg1[%c1] : memref<4xf32, #tpu.memory_space<smem>>
    %c2 = arith.constant 2 : index
    %2 = memref.load %arg1[%c2] : memref<4xf32, #tpu.memory_space<smem>>
    %c3 = arith.constant 3 : index
    %3 = memref.load %arg1[%c3] : memref<4xf32, #tpu.memory_space<smem>>
    %c0_0 = arith.constant 0 : index
    %c0_1 = arith.constant 0 : index
    %4 = vector.load %arg2[%c0_0, %c0_1] : memref<16x128xf32, #tpu.memory_space<vmem>>, vector<16x128xf32>
    %cst = arith.constant 0.000000e+00 : f32
    %5 = vector.broadcast %cst : f32 to vector<16x128xf32>
    %6 = arith.maximumf %4, %5 : vector<16x128xf32>
    %cst_2 = arith.constant 2.200000e+00 : f32
    %7 = vector.broadcast %cst_2 : f32 to vector<16x128xf32>
    %8 = math.powf %6, %7 : vector<16x128xf32>
    %9 = vector.broadcast %0 : f32 to vector<16x128xf32>
    %10 = arith.mulf %9, %8 : vector<16x128xf32>
    %11 = vector.broadcast %1 : f32 to vector<16x128xf32>
    %12 = arith.addf %10, %11 : vector<16x128xf32>
    %cst_3 = arith.constant 5.000000e-03 : f32
    %cst_4 = arith.constant 1.000000e+04 : f32
    %13 = vector.broadcast %cst_3 : f32 to vector<16x128xf32>
    %14 = arith.maximumf %13, %12 : vector<16x128xf32>
    %15 = vector.broadcast %cst_4 : f32 to vector<16x128xf32>
    %16 = arith.minimumf %15, %14 : vector<16x128xf32>
    %cst_5 = arith.constant 0.906256258 : f32
    %17 = vector.broadcast %cst_5 : f32 to vector<16x128xf32>
    %18 = math.powf %16, %17 : vector<16x128xf32>
    %cst_6 = arith.constant 0.373465866 : f32
    %19 = vector.broadcast %cst_6 : f32 to vector<16x128xf32>
    %20 = arith.mulf %19, %18 : vector<16x128xf32>
    %cst_7 = arith.constant 0.353487909 : f32
    %21 = vector.broadcast %cst_7 : f32 to vector<16x128xf32>
    %22 = arith.addf %21, %20 : vector<16x128xf32>
    %cst_8 = arith.constant 8.27704934E-5 : f32
    %23 = vector.broadcast %cst_8 : f32 to vector<16x128xf32>
    %24 = arith.mulf %23, %18 : vector<16x128xf32>
    %cst_9 = arith.constant 1.000000e+00 : f32
    %25 = vector.broadcast %cst_9 : f32 to vector<16x128xf32>
    %26 = arith.addf %25, %24 : vector<16x128xf32>
    %27 = arith.divf %22, %26 : vector<16x128xf32>
    %cst_10 = arith.constant 0.0915030315 : f32
    %28 = vector.broadcast %cst_10 : f32 to vector<16x128xf32>
    %29 = math.powf %27, %28 : vector<16x128xf32>
    %30 = vector.broadcast %2 : f32 to vector<16x128xf32>
    %31 = arith.mulf %30, %29 : vector<16x128xf32>
    %32 = vector.broadcast %3 : f32 to vector<16x128xf32>
    %33 = arith.addf %31, %32 : vector<16x128xf32>
    %c0_11 = arith.constant 0 : index
    %c0_12 = arith.constant 0 : index
    %34 = vector.load %arg3[%c0_11, %c0_12] : memref<16x128xf32, #tpu.memory_space<vmem>>, vector<16x128xf32>
    tpu.vector_store %arg3[%c0_11, %c0_12], %33 {strides = array<i32>} : memref<16x128xf32, #tpu.memory_space<vmem>>, vector<16x128xf32>,
    return
  }
  func.func @transform_0(%arg0: i32, %arg1: memref<4xf32, #tpu.memory_space<smem>>) -> (i32, i32) {
    %c0_i32 = arith.constant 0 : i32
    %c0_i32_0 = arith.constant 0 : i32
    return %arg0, %c0_i32 : i32, i32
  }
  func.func @transform_1(%arg0: i32, %arg1: memref<4xf32, #tpu.memory_space<smem>>) -> (i32, i32) {
    %c0_i32 = arith.constant 0 : i32
    %c0_i32_0 = arith.constant 0 : i32
    return %arg0, %c0_i32 : i32, i32
  }
}

</mosaic_0001>

<bundles_post_ra>
// kernel: tpu_custom_call.1
= control target key start
LH: loop header
LB: loop body
LE: loop exit
PB: predicated region body
PF: predicated region fallthrough
CT: control target
= control target key end

     0   :  { %s403_s0 = inlined_call_operand.hbm [shape: f32[4], index: 0, kind: input, shape index: {}]   ;;  %s404_s1 = inlined_call_operand.hbm [shape: f32[16,128], index: 1, kind: input, shape index: {}]   ;;  %s405_s2 = inlined_call_operand.hbm [shape: f32[16,128], index: 2, kind: output, shape index: {}]  }
   0x1   :  { %s281_s11 = scalar_lea.hbm %s403_s0, 16 }
   0x2   :  { %p282_p0 = scmp.ne.s32.totalorder %s403_s0, %s281_s11  ;;  %p285_p1 = scmp.lt.u32.totalorder %s281_s11, %s403_s0 }
   0x4   :  { %p287_p2 = pnand %p285_p1, %p282_p0 }
   0x6   :  { %290 = shalt.err (!%p287_p2)  }
   0x7   :  { %s341_s16 = smov [#allocation3]  }
   0x8   :  { %8 = dma.hbm_to_smem %s403_s0, 16, %s341_s16, [#allocation2] }
   0x9   :  { %335 = dma.done.wait [#allocation2], 16 }
   0xa   :  { %336 = vsyncadd [#allocation2], 4294967280 }
   0xb   :  { %10 = sfence }
   0xc   :  { %11 = vsyncpa [#allocation5], 0 }
   0xd   :  { %12 = vsyncpa [#allocation6], 0  ;;  %s342_s19 = smov [#allocation4]   ;;  %s291_s23 = scalar_lea.hbm %s404_s1, 256 }
   0xe   :  { %s18_s20 = sshll.u32 %s342_s19, 4  ;;  %p292_p3 = scmp.ne.s32.totalorder %s404_s1, %s291_s23  ;;  %s19_s20 = int_to_ptr.vmem [resolvable:$true] %s18_s20 }
   0xf   :  { %p295_p4 = scmp.lt.u32.totalorder %s291_s23, %s404_s1 }
  0x11   :  { %p297_p5 = pnand %p295_p4, %p292_p3 }
  0x13   :  { %300 = shalt.err (!%p297_p5)
}
  0x14   :  { %s301_s0 = scalar_lea.vmem %s19_s20, 256  ;;  %p306_p7 = scmp.lt.s32.totalorder %s19_s20, %s19_s20 }
  0x15   :  { %p302_p6 = scmp.ne.s32.totalorder %s19_s20, %s301_s0  ;;  %p307_p8 = scmp.lt.s32.totalorder %s301_s0, %s301_s0 }
  0x17   :  { %p308_p9 = por %p307_p8, %p306_p7 }
  0x19   :  { %p309_p10 = pnand %p308_p9, %p302_p6 }
  0x1b   :  { %312 = shalt.err (!%p309_p10)
}
  0x1c   :  { %s343_s28 = smov 128   ;;  %s344_s29 = smov 8  }
  0x1d   :  { %24 = dma.hbm_to_vmem [thread:$0]  %s404_s1, 256, %s19_s20, [#allocation5], %s343_s28, %s343_s28, %s344_s29  }
  0x1e   :  { %337 = dma.done.wait [#allocation5], 256  }
  0x1f   :  { %338 = vsyncadd [#allocation5], 4294967040  ;;  %v32_v0 = vld [vmem:[#allocation4] sm:$0xff]  ;;  %v33_v1 = vld [vmem:[#allocation4 + $0x8] sm:$0xff]  ;;  %s28_s4 = sld [smem:[#allocation3]]  ;;  %s89_s5 = sld [smem:[#allocation3 + $0x1]] }
  0x20   :  { %v34_v2 = vmax.f32 %v32_v0, 0.0  ;;  %v35_v3 = vmax.f32 %v33_v1, 0.0  ;;  %s90_s1 = sld [smem:[#allocation3 + $0x2]]  ;;  %s91_s6 = sld [smem:[#allocation3 + $0x3]] }
  0x21   :  { %s345_s7 = smov [#allocation7]  }
  0x22   :  { %v96_v4 = vand.u32 2147483647, %v34_v2  ;;  %v122_v5 = vand.u32 2147483647, %v35_v3  ;;  %vm100_vm0 = vcmp.lt.f32.partialorder %v34_v2, 0  ;;  %vm101_vm1 = vcmp.eq.f32.partialorder %v34_v2, 0 }
  0x23   :  { %vm126_vm2 = vcmp.lt.f32.partialorder %v35_v3, 0  ;;  %vm127_vm4 = vcmp.eq.f32.partialorder %v35_v3, 0  ;;  %vm113_vm5 = vcmp.ne.f32.partialorder %v34_v2, %v34_v2  ;;  %vm102_vm7 = vcmp.eq.f32.partialorder %v34_v2, 1065353216  ;;  %s77_s8 = sshll.u32 %s345_s7, 4  ;;  %s78_s8 = int_to_ptr.vmem [resolvable:$true] %s77_s8 }
  0x24   :  { %253 = vlog2.f32 %v96_v4  ;;  %vm105_vm3 = vcmp.eq.f32.partialorder %v96_v4, 2139095040  ;;  %vm131_vm6 = vcmp.eq.f32.partialorder %v122_v5, 2139095040  ;;  %vm139_vm8 = vcmp.ne.f32.partialorder %v35_v3, %v35_v3  ;;  %s313_s9 = scalar_lea.vmem %s78_s8, 256  ;;  %p318_p12 = scmp.lt.s32.totalorder %s78_s8, %s78_s8 }
  0x25   :  { %255 = vlog2.f32 %v122_v5  ;;  %vm128_vm9 = vcmp.eq.f32.partialorder %v35_v3, 1065353216  ;;  %v38_v17 = vstv %s28_s4  ;;  %v41_v22 = vstv %s89_s5  ;;  %p314_p11 = scmp.ne.s32.totalorder %s78_s8, %s313_s9  ;;  %p319_p13 = scmp.lt.s32.totalorder %s313_s9, %s313_s9 }
  0x27   :  { %p320_p0 = por %p319_p13, %p318_p12 }
  0x29   :  { %p321_p1 = pnand %p320_p0, %p314_p11 }
  0x2e   :  { %v254_v6 = vpop.eup %253 }
  0x2f   :  { %v256_v7 = vpop.eup %255  ;;  %v98_v8 = vmul.f32 2.2, %v254_v6 }
  0x30   :  { %v124_v9 = vmul.f32 2.2, %v256_v7 }
  0x31   :  { %257 = vpow2.f32 %v98_v8 }
  0x32   :  { %259 = vpow2.f32 %v124_v9 }
  0x3b   :  { %v258_v10 = vpop.eup %257 }
  0x3c   :  { %v260_v11 = vpop.eup %259  ;;  %v106_v12 = vsel %vm100_vm0, 2143289344, %v258_v10  ;;  %v64_v10 = vstv %s90_s1 }
  0x3d   :  { %v107_v13 = vsel %vm101_vm1, 0, %v106_v12  ;;  %v132_v14 = vsel %vm126_vm2, 2143289344, %v260_v11 }
  0x3e   :  { %v112_v15 = vsel %vm105_vm3, 2139095040, %v107_v13  ;;  %v133_v16 = vsel %vm127_vm4, 0, %v132_v14 }
  0x3f   :  { %v116_v18 = vsel %vm113_vm5, 2143289344, %v112_v15  ;;  %v138_v19 = vsel %vm131_vm6, 2139095040, %v133_v16  ;;  %v67_v15 = vstv %s91_s6 }
  0x40   :  { %v117_v20 = vsel %vm102_vm7, 1065353216, %v116_v18  ;;  %v142_v21 = vsel %vm139_vm8, 2143289344, %v138_v19 }
  0x41   :  { %v143_v23 = vsel %vm128_vm9, 1065353216, %v142_v21  ;;  %v39_v24 = vmul.f32 %v117_v20, %v38_v17 }
  0x42   :  { %v40_v25 = vmul.f32 %v143_v23, %v38_v17 }
  0x43   :  { %v42_v26 = vadd.f32 %v41_v22, %v39_v24 }
  0x44   :  { %v43_v27 = vadd.f32 %v41_v22, %v40_v25 }
  0x45   :  { %v44_v28 = vmax.f32 %v42_v26, 0.005 }
  0x46   :  { %v45_v29 = vmax.f32 %v43_v27, 0.005 }
  0x47   :  { %v46_v30 = vmin.f32 %v44_v28, 10000.0 }
  0x48   :  { %v47_v31 = vmin.f32 %v45_v29, 10000.0 }
  0x49   :  { %v148_v32 = vand.u32 2147483647, %v46_v30  ;;  %vm152_vm10 = vcmp.lt.f32.partialorder %v46_v30, 0  ;;  %vm153_vm11 = vcmp.eq.f32.partialorder %v46_v30, 0  ;;  %vm165_vm15 = vcmp.ne.f32.partialorder %v46_v30, %v46_v30 }
  0x4a   :  { %v174_v33 = vand.u32 2147483647, %v47_v31  ;;  %vm178_vm12 = vcmp.lt.f32.partialorder %v47_v31, 0  ;;  %vm179_vm14 = vcmp.eq.f32.partialorder %v47_v31, 0  ;;  %vm154_vm1 = vcmp.eq.f32.partialorder %v46_v30, 1065353216 }
  0x4b   :  { %261 = vlog2.f32 %v148_v32  ;;  %vm157_vm13 = vcmp.eq.f32.partialorder %v148_v32, 2139095040  ;;  %vm191_vm2 = vcmp.ne.f32.partialorder %v47_v31, %v47_v31  ;;  %vm180_vm3 = vcmp.eq.f32.partialorder %v47_v31, 1065353216 }
  0x4c   :  { %263 = vlog2.f32 %v174_v33  ;;  %vm183_vm0 = vcmp.eq.f32.partialorder %v174_v33, 2139095040 }
  0x55   :  { %v262_v34 = vpop.eup %261 }
  0x56   :  { %v264_v35 = vpop.eup %263  ;;  %v150_v36 = vmul.f32 0.90625626, %v262_v34 }
  0x57   :  { %v176_v37 = vmul.f32 0.90625626, %v264_v35 }
  0x58   :  { %265 = vpow2.f32 %v150_v36 }
  0x59   :  { %267 = vpow2.f32 %v176_v37 }
  0x62   :  { %v266_v38 = vpop.eup %265 }
  0x63   :  { %v268_v39 = vpop.eup %267  ;;  %v158_v40 = vsel %vm152_vm10, 2143289344, %v266_v38 }
  0x64   :  { %v159_v41 = vsel %vm153_vm11, 0, %v158_v40  ;;  %v184_v42 = vsel %vm178_vm12, 2143289344, %v268_v39 }
  0x65   :  { %v164_v43 = vsel %vm157_vm13, 2139095040, %v159_v41  ;;  %v185_v44 = vsel %vm179_vm14, 0, %v184_v42 }
  0x66   :  { %v168_v45 = vsel %vm165_vm15, 2143289344, %v164_v43  ;;  %v190_v46 = vsel %vm183_vm0, 2139095040, %v185_v44 }
  0x67   :  { %v169_v47 = vsel %vm154_vm1, 1065353216, %v168_v45  ;;  %v194_v48 = vsel %vm191_vm2, 2143289344, %v190_v46 }
  0x68   :  { %v54_v49 = vmul.f32 8.277049e-05, %v169_v47  ;;  %v195_v50 = vsel %vm180_vm3, 1065353216, %v194_v48  ;;  %v50_v54 = vmul.f32 0.37346587, %v169_v47 }
  0x69   :  { %v55_v51 = vmul.f32 8.277049e-05, %v195_v50  ;;  %v51_v55 = vmul.f32 0.37346587, %v195_v50 }
  0x6a   :  { %v56_v52 = vadd.f32 1.0, %v54_v49  ;;  %v52_v56 = vadd.f32 0.3534879, %v50_v54 }
  0x6b   :  { %v57_v53 = vadd.f32 1.0, %v55_v51  ;;  %v53_v57 = vadd.f32 0.3534879, %v51_v55 }
  0x6c   :  { %269 = vrcp.f32 %v56_v52 }
  0x6d   :  { %271 = vrcp.f32 %v57_v53 }
  0x76   :  { %v270_v58 = vpop.eup %269 }
  0x77   :  { %v272_v59 = vpop.eup %271  ;;  %v59_v60 = vmul.f32 %v270_v58, %v52_v56 }
  0x78   :  { %v61_v61 = vmul.f32 %v272_v59, %v53_v57 }
  0x79   :  { %v200_v62 = vand.u32 2147483647, %v59_v60  ;;  %vm204_vm4 = vcmp.lt.f32.partialorder %v59_v60, 0  ;;  %vm205_vm5 = vcmp.eq.f32.partialorder %v59_v60, 0  ;;  %vm217_vm9 = vcmp.ne.f32.partialorder %v59_v60, %v59_v60 }
  0x7a   :  { %v226_v63 = vand.u32 2147483647, %v61_v61  ;;  %vm230_vm6 = vcmp.lt.f32.partialorder %v61_v61, 0  ;;  %vm231_vm8 = vcmp.eq.f32.partialorder %v61_v61, 0  ;;  %vm206_vm11 = vcmp.eq.f32.partialorder %v59_v60, 1065353216 }
  0x7b   :  { %273 = vlog2.f32 %v200_v62  ;;  %vm209_vm7 = vcmp.eq.f32.partialorder %v200_v62, 2139095040  ;;  %vm243_vm12 = vcmp.ne.f32.partialorder %v61_v61, %v61_v61  ;;  %vm232_vm13 = vcmp.eq.f32.partialorder %v61_v61, 1065353216 }
  0x7c   :  { %275 = vlog2.f32 %v226_v63  ;;  %vm235_vm10 = vcmp.eq.f32.partialorder %v226_v63, 2139095040 }
  0x85   :  { %v274_v0 = vpop.eup %273 }
  0x86   :  { %v276_v1 = vpop.eup %275  ;;  %v202_v2 = vmul.f32 0.09150303, %v274_v0 }
  0x87   :  { %v228_v3 = vmul.f32 0.09150303, %v276_v1 }
  0x88   :  { %277 = vpow2.f32 %v202_v2 }
  0x89   :  { %279 = vpow2.f32 %v228_v3 }
  0x92   :  { %v278_v4 = vpop.eup %277 }
  0x93   :  { %v280_v5 = vpop.eup %279  ;;  %v210_v6 = vsel %vm204_vm4, 2143289344, %v278_v4 }
  0x94   :  { %v211_v7 = vsel %vm205_vm5, 0, %v210_v6  ;;  %v236_v8 = vsel %vm230_vm6, 2143289344, %v280_v5 }
  0x95   :  { %v216_v9 = vsel %vm209_vm7, 2139095040, %v211_v7  ;;  %v237_v11 = vsel %vm231_vm8, 0, %v236_v8 }
  0x96   :  { %v220_v12 = vsel %vm217_vm9, 2143289344, %v216_v9  ;;  %v242_v13 = vsel %vm235_vm10, 2139095040, %v237_v11 }
  0x97   :  { %v221_v14 = vsel %vm206_vm11, 1065353216, %v220_v12  ;;  %v246_v16 = vsel %vm243_vm12, 2143289344, %v242_v13 }
  0x98   :  { %v65_v17 = vmul.f32 %v221_v14, %v64_v10  ;;  %v247_v18 = vsel %vm232_vm13, 1065353216, %v246_v16 }
  0x99   :  { %v66_v19 = vmul.f32 %v247_v18, %v64_v10 }
  0x9a   :  { %v68_v20 = vadd.f32 %v67_v15, %v65_v17 }
  0x9b   :  { %v69_v21 = vadd.f32 %v67_v15, %v66_v19 }
  0x9c   :  { %70 = vst [vmem:[#allocation7] sm:$0xff] %v68_v20 }
  0x9d   :  { %71 = vst [vmem:[#allocation7 + $0x8] sm:$0xff] %v69_v21 }
  0x9e   :  { %324 = shalt.err (!%p321_p1)
}
  0x9f   :  { %s325_s12 = scalar_lea.hbm %s405_s2, 256 }
  0xa0   :  { %p326_p2 = scmp.ne.s32.totalorder %s405_s2, %s325_s12  ;;  %p329_p3 = scmp.lt.u32.totalorder %s325_s12, %s405_s2 }
  0xa2   :  { %p331_p4 = pnand %p329_p3, %p326_p2 }
  0xa4   :  { %334 = shalt.err (!%p331_p4)
}
  0xa5   :  { %83 = dma.vmem_to_hbm [thread:$0]  %s78_s8, 256, %s405_s2, [#allocation6], %s343_s28, %s343_s28, %s344_s29  }
  0xa6   :  { %339 = dma.done.wait [#allocation6], 256  }
  0xa7   :  { %340 = vsyncadd [#allocation6], 4294967040 }
  0xa8   :  { %87 = vsyncpa [#allocation5], 1 }
  0xa9   :  { %88 = vsyncpa [#allocation6], 1 }

</bundles_post_ra>
